<compile_context>
chip_gen: v7x
topology: tpu7x:2x2x1
jax: 0.10.0
libtpu: 0.0.40
codegen_flags: <defaults>
</compile_context>

<pallas_src>
import jax
import jax.numpy as jnp
from jax.experimental import pallas as pl
from jax.experimental.pallas import tpu as pltpu


# ---------------------------------------------------------------------------
# Kernel
# ---------------------------------------------------------------------------
def att_agg_kernel(x_ref, w_att_ref, w_cat_ref, b_cat_ref, out_ref):
    # x_ref:     [TB, S, F2]  VMEM  -- batch tile of the stacked sequence
    # w_att_ref: [F2, 1]      VMEM  -- Linear(2H, 1) weight (resident)
    # w_cat_ref: [F2, H]      VMEM  -- lin_cat weight, [in, out] layout (resident)
    # b_cat_ref: [1, H]       VMEM  -- lin_cat bias (resident)
    # out_ref:   [TB, H]      VMEM
    tb, s, f2 = x_ref.shape
    x_raw = x_ref[...]                                    # input dtype (f32 or bf16)
    xf = x_raw.astype(jnp.float32)                        # f32 math (v5e: no bf16 VPU/EUP)

    # Attention scores: Linear(2H -> 1) as an MXU matmul (vector-extended slot
    # is otherwise idle here) instead of an XLU lane-reduce over F2.
    # The [TB, S, F2] -> [TB*S, F2] view is layout-free when S % 8 == 0.
    w_att = w_att_ref[...].astype(x_raw.dtype)            # [F2, 1]
    scores = jnp.dot(x_raw.reshape(tb * s, f2), w_att,
                     preferred_element_type=jnp.float32)  # [TB*S, 1]
    scores = scores.reshape(tb, s)                        # [TB, S]  (S on lanes)

    # Softmax over the sequence axis (dim=1 of the PyTorch module). The scalar
    # attention bias is omitted: softmax is shift-invariant, so it cancels.
    m = jnp.max(scores, axis=-1, keepdims=True)           # XLU lane reduce
    e = jnp.exp(scores - m)                               # EUP
    denom = jnp.sum(e, axis=-1, keepdims=True)            # [TB, 1]
    r = pl.reciprocal(denom, approx=True)                 # EUP vrcp
    r = r * (2.0 - denom * r)                             # Newton step -> ~f32 precision
    attn = e * r                                          # [TB, S]

    # Weighted sum over the sequence (VPU multiply + sublane reduce over S).
    h = jnp.sum(xf * attn[:, :, None], axis=1)            # [TB, F2]

    # lin_cat(relu(h)): one batched MXU matmul for the whole tile.
    h = jnp.maximum(h, 0.0)
    y = jnp.dot(h, w_cat_ref[...], preferred_element_type=jnp.float32)
    y = y + b_cat_ref[...]                                 # [TB, H]
    out_ref[...] = y.astype(out_ref.dtype)


# ---------------------------------------------------------------------------
# VMEM-budget-driven tiling
# ---------------------------------------------------------------------------
def _round_up(x, m):
    return (x + m - 1) // m * m


def _padded_bytes(shape, dtype):
    """Approximate VMEM bytes of a tile after (sublane, lane) padding."""
    itemsize = jnp.dtype(dtype).itemsize
    dims = list(shape)
    dims[-1] = _round_up(dims[-1], 128)                       # lane dim
    if len(dims) >= 2:
        dims[-2] = _round_up(dims[-2], 8 * (4 // itemsize))   # sublane dim (packed)
    n = itemsize
    for d in dims:
        n *= d
    return n


def _vmem_caps():
    """(physical VMEM bytes, usable budget). Generation-aware, safe fallback."""
    try:
        cap = int(pltpu.get_tpu_info().vmem_capacity_bytes)
    except Exception:
        cap = 0
    if cap < (32 << 20):
        cap = 64 << 20              # conservative default: v7x per-core VMEM
    return cap, (cap * 3) // 4      # ~48 MiB on v7x, ~96 MiB on v5e/v6e


def _tile_plan(B, S, F2, H, x_dtype):
    """Pick the batch tile TB and the scoped-VMEM limit to request."""
    cap, budget = _vmem_caps()
    # Grid-invariant operands (double-buffered by the default pipeline).
    fixed = 2 * (_padded_bytes((F2, 1), jnp.float32)
                 + _padded_bytes((F2, H), jnp.float32)
                 + _padded_bytes((1, H), jnp.float32))
    # Per-batch-row cost: double-buffered x tile + double-buffered output rows.
    per_row = 2 * (_padded_bytes((S, F2), x_dtype) + _round_up(H, 128) * 4)

    tb = max((budget - fixed) // per_row, 8)
    tb = (tb // 8) * 8
    if B > 8:
        # Keep >= 2 grid steps so the "parallel" axis can shard across the two
        # TensorCores on v7x.
        tb = min(tb, max(8, _round_up(-(-B // 2), 8)))
    # Never exceed the batch (TB == B is allowed for tiny batches; otherwise TB
    # stays a multiple of 8 so the [TB, H] output block is sublane-aligned).
    tb = min(tb, B if B < 8 else _round_up(B, 8))
    tb = max(int(tb), 1)

    footprint = fixed + tb * per_row + (2 << 20)           # + slack for internal scratch
    vmem_limit = int(min(max(budget, footprint), cap - (2 << 20)))
    return tb, vmem_limit


# ---------------------------------------------------------------------------
# Wrapper
# ---------------------------------------------------------------------------
def seq_aggregator_att(x, w_att, b_att, w_cat, b_cat):
    """SeqAggregator(mode='att') forward.

    x: list of S arrays, each [B, 2H] (the `xs` list in forward()), or an
       already-stacked [B, S, 2H] array (preferred -- avoids an extra HBM round
       trip). May be float32 or bfloat16; bf16 halves HBM read traffic for this
       input-bandwidth-bound op while in-kernel math stays f32.
    b_att: accepted for parity with the PyTorch module but unused -- softmax
       over the sequence axis is shift-invariant, so the scalar bias cancels.
    Returns [B, H] float32.
    """
    del b_att
    if isinstance(x, (list, tuple)):
        x = jnp.stack(x, axis=1)                           # [B, S, 2H]
    B, S, F2 = x.shape
    H = w_cat.shape[1]

    TB, vmem_limit = _tile_plan(B, S, F2, H, x.dtype)
    grid = (pl.cdiv(B, TB),)        # no batch padding: Pallas handles the ragged edge block

    return pl.pallas_call(
        att_agg_kernel,
        out_shape=jax.ShapeDtypeStruct((B, H), jnp.float32),
        grid_spec=pltpu.PrefetchScalarGridSpec(
            num_scalar_prefetch=0,
            grid=grid,
            in_specs=[
                pl.BlockSpec((TB, S, F2), lambda i: (i, 0, 0)),   # batch tile of x
                pl.BlockSpec((F2, 1), lambda i: (0, 0)),          # w_att (resident)
                pl.BlockSpec((F2, H), lambda i: (0, 0)),          # w_cat (resident)
                pl.BlockSpec((1, H), lambda i: (0, 0)),           # b_cat (resident)
            ],
            out_specs=pl.BlockSpec((TB, H), lambda i: (i, 0)),    # lane-dense 2-D output
        ),
        compiler_params=pltpu.CompilerParams(
            dimension_semantics=("parallel",),
            vmem_limit_bytes=vmem_limit),
    )(x,
      w_att.reshape(F2, 1).astype(jnp.float32),
      w_cat.astype(jnp.float32),
      b_cat.reshape(1, H).astype(jnp.float32))


# ---------------------------------------------------------------------------
# Demo / self-test
# ---------------------------------------------------------------------------
if __name__ == "__main__":
    def reference(x, w_att, b_att, w_cat, b_cat):
        scores = x @ w_att + b_att                         # [B, S, 1]
        attn = jax.nn.softmax(scores, axis=1)
        h = jnp.sum(x * attn, axis=1)                      # [B, 2H]
        return jnp.maximum(h, 0.0) @ w_cat + b_cat         # [B, H]

    B, S, hidden = 2, 8, 32
    F2 = 2 * hidden                                        # hidden_size * 2

    key = jax.random.PRNGKey(0)
    k_xs, k_watt, k_wcat, k_bcat, k_x2 = jax.random.split(key, 5)

    # sequence of S tensors, each [B, 2H] (the `xs` list passed to forward())
    xs = [jax.random.normal(k, (B, F2), jnp.float32) * 0.5
          for k in jax.random.split(k_xs, S)]
    x = jnp.stack(xs, axis=1)                              # [B, S, 2H]

    # deterministic parameters (PyTorch Linear weights stored transposed: [in, out])
    w_att = jax.random.normal(k_watt, (F2, 1), jnp.float32) * 0.1       # Linear(2H, 1)
    b_att = jnp.array([0.05], jnp.float32)
    w_cat = jax.random.normal(k_wcat, (F2, hidden), jnp.float32) * 0.1  # Linear(2H, H)
    b_cat = jax.random.normal(k_bcat, (hidden,), jnp.float32) * 0.1

    # --- main f32 test -----------------------------------------------------
    out = seq_aggregator_att(x, w_att, b_att, w_cat, b_cat)
    jax.block_until_ready(out)
    ref = reference(x, w_att, b_att, w_cat, b_cat)
    assert out.shape == (B, hidden)
    # tolerance covers MXU f32 pass differences vs the XLA reference matmuls
    assert jnp.allclose(out, ref, atol=1e-3, rtol=1e-3), "f32 mismatch vs reference"

    # --- ragged batch (B % TB != 0): exercises the un-padded edge-block path
    B2 = 20
    x2 = jax.random.normal(k_x2, (B2, S, F2), jnp.float32) * 0.5
    out2 = seq_aggregator_att(x2, w_att, b_att, w_cat, b_cat)
    jax.block_until_ready(out2)
    ref2 = reference(x2, w_att, b_att, w_cat, b_cat)
    assert out2.shape == (B2, hidden)
    assert jnp.allclose(out2, ref2, atol=1e-3, rtol=1e-3), "ragged-batch mismatch"

    # --- bf16 input path (halves HBM read bytes; in-kernel math stays f32) --
    x_bf16 = x2.astype(jnp.bfloat16)
    out_bf = seq_aggregator_att(x_bf16, w_att, b_att, w_cat, b_cat)
    jax.block_until_ready(out_bf)
    ref_bf = reference(x_bf16.astype(jnp.float32), w_att, b_att, w_cat, b_cat)
    assert jnp.allclose(out_bf, ref_bf, atol=5e-2, rtol=5e-2), "bf16 mismatch"

    print("KERNEL_OK")
</pallas_src>

<mosaic_0001>
module attributes {stable_mosaic.version = 11 : i64} {
  func.func @att_agg_kernel(%arg0: i32, %arg1: memref<2x8x64xf32, #tpu.memory_space<vmem>>, %arg2: memref<64x1xf32, #tpu.memory_space<vmem>>, %arg3: memref<64x32xf32, #tpu.memory_space<vmem>>, %arg4: memref<1x32xf32, #tpu.memory_space<vmem>>, %arg5: memref<2x32xf32, #tpu.memory_space<vmem>>) attributes {dimension_semantics = [#tpu.dimension_semantics<parallel>], iteration_bounds = array<i64: 1>, scalar_prefetch = 0 : i64, scratch_operands = 0 : i64, tpu.core_type = #tpu.core_type<tc>, window_params = [{transform_indices = @transform_0, window_bounds = array<i64: 2, 8, 64>}, {pipeline_mode = #tpu.pipeline_mode<synchronous>, transform_indices = @transform_1, window_bounds = array<i64: 64, 1>}, {pipeline_mode = #tpu.pipeline_mode<synchronous>, transform_indices = @transform_2, window_bounds = array<i64: 64, 32>}, {pipeline_mode = #tpu.pipeline_mode<synchronous>, transform_indices = @transform_3, window_bounds = array<i64: 1, 32>}, {transform_indices = @transform_4, window_bounds = array<i64: 2, 32>}]} {
    %c0 = arith.constant 0 : index
    %c0_0 = arith.constant 0 : index
    %c0_1 = arith.constant 0 : index
    %0 = vector.load %arg1[%c0, %c0_0, %c0_1] : memref<2x8x64xf32, #tpu.memory_space<vmem>>, vector<2x8x64xf32>
    %c0_2 = arith.constant 0 : index
    %c0_3 = arith.constant 0 : index
    %1 = vector.load %arg2[%c0_2, %c0_3] : memref<64x1xf32, #tpu.memory_space<vmem>>, vector<64x1xf32>
    %2 = vector.shape_cast %0 : vector<2x8x64xf32> to vector<16x64xf32>
    %cst = arith.constant dense<0.000000e+00> : vector<16x1xf32>
    %3 = tpu.matmul %2, %1, %cst {dimension_numbers = #tpu.dot_dimension_numbers<[1], [0], [0], [1], [0, 0, 1, 1], [], []>} : vector<16x64xf32>, vector<64x1xf32>, vector<16x1xf32> -> vector<16x1xf32>
    %4 = vector.shape_cast %3 : vector<16x1xf32> to vector<2x8xf32>
    %cst_4 = arith.constant dense<0xFF800000> : vector<2xf32>
    %5 = vector.multi_reduction <maximumf>, %4, %cst_4 [1] : vector<2x8xf32> to vector<2xf32>
    %6 = vector.shape_cast %5 : vector<2xf32> to vector<2x1xf32>
    %7 = vector.broadcast %6 : vector<2x1xf32> to vector<2x8xf32>
    %8 = arith.subf %4, %7 : vector<2x8xf32>
    %9 = math.exp %8 : vector<2x8xf32>
    %cst_5 = arith.constant dense<0.000000e+00> : vector<2xf32>
    %10 = vector.multi_reduction <add>, %9, %cst_5 [1] : vector<2x8xf32> to vector<2xf32>
    %11 = vector.shape_cast %10 : vector<2xf32> to vector<2x1xf32>
    %12 = tpu.reciprocal %11 {approx = true} : vector<2x1xf32> -> vector<2x1xf32>
    %13 = arith.mulf %11, %12 : vector<2x1xf32>
    %cst_6 = arith.constant 2.000000e+00 : f32
    %14 = vector.broadcast %cst_6 : f32 to vector<2x1xf32>
    %15 = arith.subf %14, %13 : vector<2x1xf32>
    %16 = arith.mulf %12, %15 : vector<2x1xf32>
    %17 = vector.broadcast %16 : vector<2x1xf32> to vector<2x8xf32>
    %18 = arith.mulf %9, %17 : vector<2x8xf32>
    %19 = vector.shape_cast %18 : vector<2x8xf32> to vector<2x8x1xf32>
    %20 = vector.broadcast %19 : vector<2x8x1xf32> to vector<2x8x64xf32>
    %21 = arith.mulf %0, %20 : vector<2x8x64xf32>
    %cst_7 = arith.constant dense<0.000000e+00> : vector<2x64xf32>
    %22 = vector.multi_reduction <add>, %21, %cst_7 [1] : vector<2x8x64xf32> to vector<2x64xf32>
    %cst_8 = arith.constant 0.000000e+00 : f32
    %23 = vector.broadcast %cst_8 : f32 to vector<2x64xf32>
    %24 = arith.maximumf %22, %23 : vector<2x64xf32>
    %c0_9 = arith.constant 0 : index
    %c0_10 = arith.constant 0 : index
    %25 = vector.load %arg3[%c0_9, %c0_10] : memref<64x32xf32, #tpu.memory_space<vmem>>, vector<64x32xf32>
    %cst_11 = arith.constant dense<0.000000e+00> : vector<2x32xf32>
    %26 = tpu.matmul %24, %25, %cst_11 {dimension_numbers = #tpu.dot_dimension_numbers<[1], [0], [0], [1], [0, 0, 1, 1], [], []>} : vector<2x64xf32>, vector<64x32xf32>, vector<2x32xf32> -> vector<2x32xf32>
    %c0_12 = arith.constant 0 : index
    %c0_13 = arith.constant 0 : index
    %27 = vector.load %arg4[%c0_12, %c0_13] : memref<1x32xf32, #tpu.memory_space<vmem>>, vector<1x32xf32>
    %28 = vector.broadcast %27 : vector<1x32xf32> to vector<2x32xf32>
    %29 = arith.addf %26, %28 : vector<2x32xf32>
    %c0_14 = arith.constant 0 : index
    %c0_15 = arith.constant 0 : index
    %30 = vector.load %arg5[%c0_14, %c0_15] : memref<2x32xf32, #tpu.memory_space<vmem>>, vector<2x32xf32>
    tpu.vector_store %arg5[%c0_14, %c0_15], %29 {strides = array<i32>} : memref<2x32xf32, #tpu.memory_space<vmem>>, vector<2x32xf32>,
    return
  }
  func.func @transform_0(%arg0: i32) -> (i32, i32, i32) {
    %c0_i32 = arith.constant 0 : i32
    %c0_i32_0 = arith.constant 0 : i32
    %c0_i32_1 = arith.constant 0 : i32
    return %arg0, %c0_i32, %c0_i32_0 : i32, i32, i32
  }
  func.func @transform_1(%arg0: i32) -> (i32, i32) {
    %c0_i32 = arith.constant 0 : i32
    %c0_i32_0 = arith.constant 0 : i32
    %c0_i32_1 = arith.constant 0 : i32
    return %c0_i32, %c0_i32_0 : i32, i32
  }
  func.func @transform_2(%arg0: i32) -> (i32, i32) {
    %c0_i32 = arith.constant 0 : i32
    %c0_i32_0 = arith.constant 0 : i32
    %c0_i32_1 = arith.constant 0 : i32
    return %c0_i32, %c0_i32_0 : i32, i32
  }
  func.func @transform_3(%arg0: i32) -> (i32, i32) {
    %c0_i32 = arith.constant 0 : i32
    %c0_i32_0 = arith.constant 0 : i32
    %c0_i32_1 = arith.constant 0 : i32
    return %c0_i32, %c0_i32_0 : i32, i32
  }
  func.func @transform_4(%arg0: i32) -> (i32, i32) {
    %c0_i32 = arith.constant 0 : i32
    %c0_i32_0 = arith.constant 0 : i32
    return %arg0, %c0_i32 : i32, i32
  }
}

</mosaic_0001>

<bundles_post_ra>
// kernel: tpu_custom_call.1
= control target key start
LH: loop header
LB: loop body
LE: loop exit
PB: predicated region body
PF: predicated region fallthrough
CT: control target
= control target key end

     0   :  { %vm28_vm0 = vcmask 523264   ;;  %s567_s0 = inlined_call_operand.vmem [shape: f32[2,8,64], index: 0, kind: input, shape index: {}]   ;;  %s568_s1 = inlined_call_operand.vmem [shape: f32[64,1], index: 1, kind: input, shape index: {}]   ;;  %s569_s2 = inlined_call_operand.vmem [shape: f32[64,32], index: 2, kind: input, shape index: {}]   ;;  %s570_s3 = inlined_call_operand.vmem [shape: f32[1,32], index: 3, kind: input, shape index: {}]   ;;  %s571_s4 = inlined_call_operand.hbm [shape: f32[2,32], index: 4, kind: output, shape index: {}]  }
   0x1   :  { %v20_v0 = vld [vmem:[%s568_s1] sm:$0xff]  ;;  %v21_v1 = vld [vmem:[%s568_s1 + $0x8] sm:$0xff]  ;;  %v22_v2 = vld [vmem:[%s568_s1 + $0x10] sm:$0xff] }
   0x2   :  { %v385_v3 = vpack.c.bf16 %v21_v1, %v20_v0  ;;  %v23_v4 = vld [vmem:[%s568_s1 + $0x18] sm:$0xff]  ;;  %v24_v6 = vld [vmem:[%s568_s1 + $0x20] sm:$0xff]  ;;  %v25_v7 = vld [vmem:[%s568_s1 + $0x28] sm:$0xff] }
   0x3   :  { %v389_v5 = vpack.c.bf16 %v23_v4, %v22_v2  ;;  %v501_v8 = vld [vmem:[%s567_s0] sm:$0xff] }
   0x4   :  { %386 = vmatprep.subr.bf16.mxu0 %v385_v3  ;;  %363 = vmatprep.mubr.msk.f32.mxu0 %vm28_vm0, %v501_v8 }
   0x5   :  { %9 = vsyncpa [#allocation3], 0  ;;  %388 = vmatpush3.bf16.msra.mxu0 %v385_v3  ;;  %v393_v9 = vpack.c.bf16 %v25_v7, %v24_v6  ;;  %v26_v10 = vld [vmem:[%s568_s1 + $0x30] sm:$0xff]  ;;  %v27_v11 = vld [vmem:[%s568_s1 + $0x38] sm:$0xff]  ;;  %v450_v14 = vmov 0   ;;  %v118_v17 = vlaneseq  ;;  %vm128_vm1 = vcmask 1041409  }
   0x6   :  { %390 = vmatprep.subr.bf16.mxu0 %v389_v5  ;;  %v397_v12 = vpack.c.bf16 %v27_v11, %v26_v10  ;;  %v514_v13 = vld [vmem:[%s567_s0 + $0x8] sm:$0xff]  ;;  %418 = vset.pattern.permute.xlu0 %v450_v14  ;;  %vm131_vm2 = vcmask 58368   ;;  %v218_v53 = vld [vmem:[%s569_s2] sm:$0xff]  ;;  %v451_v56 = vmov 0.0|0.0   ;;  %v220_v57 = vld [vmem:[%s569_s2 + $0x10] sm:$0xff]  ;;  %vm452_vm3 = vmmov 0  }
   0x7   :  { %419 = vset.pattern.permute.xlu1 %v450_v14  ;;  %v119_v18 = vand.u32 127, %v118_v17  ;;  %v121_v19 = vshrl.u32 %v118_v17, 7  ;;  %v219_v54 = vld [vmem:[%s569_s2 + $0x8] sm:$0xff]  ;;  %401 = vmatprep.subr.bf16.mxu1 %v451_v56  ;;  %v221_v58 = vld [vmem:[%s569_s2 + $0x18] sm:$0xff]  ;;  %v222_v60 = vld [vmem:[%s569_s2 + $0x20] sm:$0xff]  ;;  %v453_v2 = vmov 0.0  }
   0x8   :  { %v402_v55 = vpack.c.bf16 %v219_v54, %v218_v53  ;;  %v405_v59 = vpack.c.bf16 %v221_v58, %v220_v57  ;;  %v223_v61 = vld [vmem:[%s569_s2 + $0x28] sm:$0xff]  ;;  %v224_v63 = vld [vmem:[%s569_s2 + $0x30] sm:$0xff]  ;;  %v225_v0 = vld [vmem:[%s569_s2 + $0x38] sm:$0xff]  ;;  %382 = vmatprep.mubr.msk.f32.mxu1 %vm452_vm3, %v453_v2  ;;  %s454_s24 = smov [#allocation2]   ;;  %vm308_vm4 = vcmask 254976  }
   0x9   :  { %392 = vmatpush3.bf16.msra.mxu0 %v389_v5  ;;  %v122_v21 = vsub.s32 %v119_v18, %v121_v19  ;;  %v138_v27 = vsub.s32 0, %v121_v19  ;;  %v142_v28 = vsub.s32 1, %v121_v19  ;;  %v408_v62 = vpack.c.bf16 %v223_v61, %v222_v60  ;;  %s316_s25 = sshll.u32 %s454_s24, 4  ;;  %s317_s25 = int_to_ptr.vmem [resolvable:$true] %s316_s25 }
   0xa   :  { %394 = vmatprep.subr.bf16.mxu0 %v393_v9  ;;  %403 = vmatpush3.bf16.msra.mxu1 %v402_v55  ;;  %v411_v1 = vpack.c.bf16 %v225_v0, %v224_v63  ;;  %s426_s26 = scalar_lea.vmem %s317_s25, 32  ;;  %p431_p1 = scmp.lt.s32.totalorder %s317_s25, %s317_s25 }
   0xb   :  { %404 = vmatprep.subr.bf16.mxu1 %v451_v56  ;;  %p427_p0 = scmp.ne.s32.totalorder %s317_s25, %s426_s26  ;;  %p432_p2 = scmp.lt.s32.totalorder %s426_s26, %s426_s26 }
   0xd   :  { %396 = vmatpush3.bf16.msra.mxu0 %v393_v9  ;;  %p433_p3 = por %p432_p2, %p431_p1 }
   0xe   :  { %398 = vmatprep.subr.bf16.mxu0 %v397_v12  ;;  %406 = vmatpush3.bf16.msra.mxu1 %v405_v59 }
   0xf   :  { %407 = vmatprep.subr.bf16.mxu1 %v451_v56  ;;  %p434_p4 = pnand %p433_p3, %p427_p0 }
  0x11   :  { %400 = vmatpush3.bf16.msra.mxu0 %v397_v12 }
  0x12   :  { %409 = vmatpush3.bf16.msra.mxu1 %v408_v62 }
  0x13   :  { %410 = vmatprep.subr.bf16.mxu1 %v451_v56 }
  0x14   :  { %364 = vmatmul.mubr.msk.f32.vlgmr.msra.gmra.mrb[0].mxu0 %vm28_vm0, %v514_v13 }
  0x16   :  { %412 = vmatpush3.bf16.msra.mxu1 %v411_v1 }
  0xe7   :  { %v365_v15 = vpop.f32.mrb[0].mxu0 }
  0xe8   :  { %v101_v16 = vpop.f32.mrb[1].mxu0 }
  0xe9   :  { %113 = vperm.xlu0 %418, %v101_v16  }
  0xed   :  { %116 = vperm.xlu0 %418, %v365_v15  }
 0x168   :  { %v114_v20 = vpop.permute.xlu0 %113 }
 0x169   :  { %v123_v23 = vrot.slane %v114_v20, %v122_v21 }
 0x16c   :  { %v117_v22 = vpop.permute.xlu0 %116 }
 0x16d   :  { %v127_v24 = vrot.slane %v117_v22, %v122_v21 }
 0x16f   :  { %v129_v25 = vsel %vm128_vm1, %v127_v24, %v123_v23 }
 0x170   :  { %v132_v26 = vsel %vm131_vm2, %v129_v25, -inf }
 0x171   :  { %133 = vmax.xlane.f32.xlu1 %v132_v26 }
 0x1fe   :  { %v134_v29 = vpop.xlane.xlu1 %133 }
 0x1ff   :  { %v139_v30 = vrot.slane %v134_v29, %v138_v27  ;;  %v143_v31 = vrot.slane %v134_v29, %v142_v28 }
 0x201   :  { %v146_v32 = vsub.f32 %v101_v16, %v139_v30  ;;  %v147_v33 = vsub.f32 %v365_v15, %v143_v31 }
 0x203   :  { %v148_v34 = vmul.f32 1.442695, %v146_v32  ;;  %v150_v35 = vmul.f32 1.442695, %v147_v33 }
 0x205   :  { %420 = vpow2.f32 %v148_v34 }
 0x206   :  { %422 = vpow2.f32 %v150_v35 }
 0x20f   :  { %v421_v36 = vpop.eup %420 }
 0x210   :  { %v423_v37 = vpop.eup %422  ;;  %155 = vperm.xlu1 %419, %v421_v36  }
 0x211   :  { %158 = vperm.xlu0 %418, %v423_v37  }
 0x28f   :  { %v156_v38 = vpop.permute.xlu1 %155 }
 0x290   :  { %v159_v39 = vpop.permute.xlu0 %158  ;;  %v163_v40 = vrot.slane %v156_v38, %v122_v21 }
 0x291   :  { %v167_v41 = vrot.slane %v159_v39, %v122_v21 }
 0x293   :  { %v168_v42 = vsel %vm128_vm1, %v167_v41, %v163_v40 }
 0x294   :  { %v170_v43 = vsel %vm131_vm2, %v168_v42, 0.0 }
 0x295   :  { %171 = vadd.xlane.f32.xlu0 %v170_v43 }
 0x322   :  { %v172_v44 = vpop.xlane.xlu0 %171 }
 0x323   :  { %424 = vrcp.f32 %v172_v44 }
 0x32d   :  { %v425_v45 = vpop.eup %424 }
 0x32e   :  { %v174_v46 = vmul.f32 %v425_v45, %v172_v44 }
 0x330   :  { %v175_v47 = vsub.f32 2.0, %v174_v46 }
 0x332   :  { %v176_v48 = vmul.f32 %v425_v45, %v175_v47 }
 0x334   :  { %v181_v49 = vrot.slane %v176_v48, %v138_v27  ;;  %v185_v50 = vrot.slane %v176_v48, %v142_v28 }
 0x336   :  { %v188_v51 = vmul.f32 %v421_v36, %v181_v49  ;;  %v189_v52 = vmul.f32 %v423_v37, %v185_v50 }
 0x338   :  { %192 = vperm.xlu1 %419, %v188_v51  }
 0x33c   :  { %197 = vperm.xlu1 %419, %v189_v52  }
 0x3b7   :  { %v193_v3 = vpop.permute.xlu1 %192 }
 0x3b8   :  { %v200_v4 = vmul.f32 %v193_v3, %v501_v8 }
 0x3ba   :  { %v202_v5 = vsel %vm28_vm0, %v200_v4, 0.0 }
 0x3bb   :  { %v203_v6 = vrot.slane %v202_v5, 4  ;;  %v198_v7 = vpop.permute.xlu1 %197 }
 0x3bc   :  { %v201_v9 = vmul.f32 %v198_v7, %v514_v13  ;;  %v326_v13 = vld [vmem:[%s570_s3] ss:$0 sm:$0xff] }
 0x3bd   :  { %v204_v10 = vadd.f32 %v203_v6, %v202_v5 }
 0x3be   :  { %v209_v11 = vsel %vm28_vm0, %v201_v9, 0.0 }
 0x3bf   :  { %v205_v12 = vrot.slane %v204_v10, 2  ;;  %v210_v14 = vrot.slane %v209_v11, 4 }
 0x3c1   :  { %v206_v15 = vadd.f32 %v205_v12, %v204_v10  ;;  %v211_v16 = vadd.f32 %v210_v14, %v209_v11 }
 0x3c3   :  { %v207_v17 = vrot.slane %v206_v15, 1  ;;  %v212_v18 = vrot.slane %v211_v16, 2 }
 0x3c5   :  { %v213_v19 = vadd.f32 %v212_v18, %v211_v16  ;;  %v208_v20 = vadd.f32 %v207_v17, %v206_v15 }
 0x3c7   :  { %v214_v21 = vrot.slane %v213_v19, 1  ;;  %v216_v8 = vmax.f32 %v208_v20, 0.0 }
 0x3c9   :  { %v215_v22 = vadd.f32 %v214_v21, %v213_v19 }
 0x3cb   :  { %v217_v23 = vmax.f32 %v215_v22, 0.0 }
 0x3cd   :  { %v235_v24 = vsel %vm128_vm1, %v217_v23, %v216_v8 }
 0x3ce   :  { %383 = vmatmul.mubr.msk.f32.vlgmr.msra.gmra.mrb[0].mxu1 %vm28_vm0, %v235_v24 }
 0x4a1   :  { %v304_v25 = vpop.f32.mrb[0].mxu1 }
 0x4a2   :  { %v305_v26 = vadd.f32 %v326_v13, %v304_v25  ;;  %v384_v27 = vpop.f32.mrb[1].mxu1 }
 0x4a4   :  { %309 = vst.msk [vmem:[#allocation2] sm:$0x3] %vm308_vm4, %v305_v26 }
 0x4a5   :  { %437 = shalt.err (!%p434_p4)
}
 0x4a6   :  { %s438_s29 = scalar_lea.hbm %s571_s4, 32 }
 0x4a7   :  { %p439_p5 = scmp.ne.s32.totalorder %s571_s4, %s438_s29  ;;  %p442_p6 = scmp.lt.u32.totalorder %s438_s29, %s571_s4 }
 0x4a9   :  { %p444_p7 = pnand %p442_p6, %p439_p5 }
 0x4ab   :  { %447 = shalt.err (!%p444_p7)
}
 0x4ac   :  { %319 = dma.vmem_to_hbm [thread:$0]  %s317_s25, 32, %s571_s4, [#allocation3]  }
 0x4ad   :  { %448 = dma.done.wait [#allocation3], 32  }
 0x4ae   :  { %449 = vsyncadd [#allocation3], 4294967264 }
 0x4af   :  { %323 = vsyncpa [#allocation3], 1 }

</bundles_post_ra>
